<compile_context>
chip_gen: v7x
topology: tpu7x:2x2x1
jax: 0.10.0
libtpu: 0.0.40
codegen_flags: <defaults>
</compile_context>

<pallas_src>
import functools

import jax
import jax.numpy as jnp
from jax.experimental import pallas as pl
from jax.experimental.pallas import tpu as pltpu

NEG_SLOPE = 0.01  # F.leaky_relu default negative_slope


def _leaky_relu(v):
    return jnp.where(v > 0, v, NEG_SLOPE * v)


def discrimator_kernel(p_ref, x_ref, o_ref):
    # p_ref: SMEM scalars [12] = [w1(4), b1(2), w2(4), b2(2)] (row-major weights)
    # x_ref: VMEM tile [2, TB]  (features on sublanes, batch on lanes)
    # o_ref: VMEM tile [2, TB]
    x0 = x_ref[0:1, :]  # [1, TB]
    x1 = x_ref[1:2, :]  # [1, TB]

    w1_00, w1_01, w1_10, w1_11, b1_0, b1_1 = (p_ref[i] for i in range(6))
    w2_00, w2_01, w2_10, w2_11, b2_0, b2_1 = (p_ref[i] for i in range(6, 12))

    # fc1 + leaky_relu  (h_j = sum_i W1[j, i] * x_i + b1[j])
    h0 = _leaky_relu(w1_00 * x0 + w1_01 * x1 + b1_0)
    h1 = _leaky_relu(w1_10 * x0 + w1_11 * x1 + b1_1)

    # fc2 + leaky_relu
    y0 = _leaky_relu(w2_00 * h0 + w2_01 * h1 + b2_0)
    y1 = _leaky_relu(w2_10 * h0 + w2_11 * h1 + b2_1)

    o_ref[...] = jnp.concatenate([y0, y1], axis=0).astype(o_ref.dtype)


@functools.partial(jax.jit, static_argnames=("tb",))
def discrimator_forward(x, w1, b1, w2, b2, *, tb=8192):
    """x: [B, 2]; w1, w2: [out, in] = [2, 2] (PyTorch convention); b1, b2: [2]."""
    B = x.shape[0]
    compute_dtype = jnp.float32

    # Wrapper-side layout plumbing: batch onto lanes, pad lanes to a multiple
    # of the tile width (itself a multiple of 128).
    xt = x.astype(compute_dtype).T  # [2, B]
    if B >= tb:
        TB = tb
        B_pad = pl.cdiv(B, TB) * TB
    else:
        B_pad = ((B + 127) // 128) * 128
        B_pad = max(B_pad, 128)
        TB = B_pad
    if B_pad != B:
        xt = jnp.pad(xt, ((0, 0), (0, B_pad - B)))

    # All 12 parameters as SMEM scalars (row-major weights, then biases).
    params = jnp.concatenate(
        [w1.reshape(-1), b1.reshape(-1), w2.reshape(-1), b2.reshape(-1)]
    ).astype(jnp.float32)  # [12]

    grid_spec = pltpu.PrefetchScalarGridSpec(
        num_scalar_prefetch=1,
        grid=(B_pad // TB,),
        in_specs=[pl.BlockSpec((2, TB), lambda i, p: (0, i))],
        out_specs=pl.BlockSpec((2, TB), lambda i, p: (0, i)),
    )

    out_t = pl.pallas_call(
        discrimator_kernel,
        out_shape=jax.ShapeDtypeStruct((2, B_pad), compute_dtype),
        grid_spec=grid_spec,
        compiler_params=pltpu.CompilerParams(
            dimension_semantics=("parallel",),
        ),
    )(params, xt)

    # Back to the PyTorch [B, 2] layout (wrapper-side, not in-kernel).
    return out_t[:, :B].T


def _reference(x, w1, b1, w2, b2):
    h = x @ w1.T + b1
    h = jnp.where(h > 0, h, NEG_SLOPE * h)
    y = h @ w2.T + b2
    return jnp.where(y > 0, y, NEG_SLOPE * y)


if __name__ == "__main__":
    key = jax.random.PRNGKey(0)
    kx, kw1, kb1, kw2, kb2, kx2 = jax.random.split(key, 6)

    # Deterministic parameter init mimicking nn.Linear's uniform(-1/sqrt(in), 1/sqrt(in)).
    bound = 1.0 / jnp.sqrt(2.0)
    w1 = jax.random.uniform(kw1, (2, 2), minval=-bound, maxval=bound, dtype=jnp.float32)
    b1 = jax.random.uniform(kb1, (2,), minval=-bound, maxval=bound, dtype=jnp.float32)
    w2 = jax.random.uniform(kw2, (2, 2), minval=-bound, maxval=bound, dtype=jnp.float32)
    b2 = jax.random.uniform(kb2, (2,), minval=-bound, maxval=bound, dtype=jnp.float32)

    # Small-batch check (single tile; grid=1).
    B = 8
    x = jax.random.normal(kx, (B, 2), dtype=jnp.float32)
    out = jax.block_until_ready(discrimator_forward(x, w1, b1, w2, b2))
    ref = _reference(x, w1, b1, w2, b2)
    assert out.shape == (B, 2)
    assert jnp.allclose(out, ref, atol=1e-5, rtol=1e-5), "small-batch mismatch vs reference"

    # Multi-tile check with padding (exercises the pipelined 'parallel' grid).
    B2 = 1000
    x2 = jax.random.normal(kx2, (B2, 2), dtype=jnp.float32)
    out2 = jax.block_until_ready(discrimator_forward(x2, w1, b1, w2, b2, tb=256))
    ref2 = _reference(x2, w1, b1, w2, b2)
    assert out2.shape == (B2, 2)
    assert jnp.allclose(out2, ref2, atol=1e-5, rtol=1e-5), "multi-tile mismatch vs reference"

    print("KERNEL_OK")
</pallas_src>

<mosaic_0001>
module attributes {stable_mosaic.version = 11 : i64} {
  func.func @discrimator_kernel(%arg0: i32, %arg1: memref<12xf32, #tpu.memory_space<smem>>, %arg2: memref<2x128xf32, #tpu.memory_space<vmem>>, %arg3: memref<2x128xf32, #tpu.memory_space<vmem>>) attributes {dimension_semantics = [#tpu.dimension_semantics<parallel>], iteration_bounds = array<i64: 1>, scalar_prefetch = 1 : i64, scratch_operands = 0 : i64, tpu.core_type = #tpu.core_type<tc>, window_params = [{transform_indices = @transform_0, window_bounds = array<i64: 2, 128>}, {transform_indices = @transform_1, window_bounds = array<i64: 2, 128>}]} {
    %c0 = arith.constant 0 : index
    %c0_0 = arith.constant 0 : index
    %0 = vector.load %arg2[%c0, %c0_0] : memref<2x128xf32, #tpu.memory_space<vmem>>, vector<1x128xf32>
    %c1 = arith.constant 1 : index
    %c0_1 = arith.constant 0 : index
    %1 = vector.load %arg2[%c1, %c0_1] : memref<2x128xf32, #tpu.memory_space<vmem>>, vector<1x128xf32>
    %c0_2 = arith.constant 0 : index
    %2 = memref.load %arg1[%c0_2] : memref<12xf32, #tpu.memory_space<smem>>
    %c1_3 = arith.constant 1 : index
    %3 = memref.load %arg1[%c1_3] : memref<12xf32, #tpu.memory_space<smem>>
    %c2 = arith.constant 2 : index
    %4 = memref.load %arg1[%c2] : memref<12xf32, #tpu.memory_space<smem>>
    %c3 = arith.constant 3 : index
    %5 = memref.load %arg1[%c3] : memref<12xf32, #tpu.memory_space<smem>>
    %c4 = arith.constant 4 : index
    %6 = memref.load %arg1[%c4] : memref<12xf32, #tpu.memory_space<smem>>
    %c5 = arith.constant 5 : index
    %7 = memref.load %arg1[%c5] : memref<12xf32, #tpu.memory_space<smem>>
    %c6 = arith.constant 6 : index
    %8 = memref.load %arg1[%c6] : memref<12xf32, #tpu.memory_space<smem>>
    %c7 = arith.constant 7 : index
    %9 = memref.load %arg1[%c7] : memref<12xf32, #tpu.memory_space<smem>>
    %c8 = arith.constant 8 : index
    %10 = memref.load %arg1[%c8] : memref<12xf32, #tpu.memory_space<smem>>
    %c9 = arith.constant 9 : index
    %11 = memref.load %arg1[%c9] : memref<12xf32, #tpu.memory_space<smem>>
    %c10 = arith.constant 10 : index
    %12 = memref.load %arg1[%c10] : memref<12xf32, #tpu.memory_space<smem>>
    %c11 = arith.constant 11 : index
    %13 = memref.load %arg1[%c11] : memref<12xf32, #tpu.memory_space<smem>>
    %14 = vector.broadcast %2 : f32 to vector<1x128xf32>
    %15 = arith.mulf %14, %0 : vector<1x128xf32>
    %16 = vector.broadcast %3 : f32 to vector<1x128xf32>
    %17 = arith.mulf %16, %1 : vector<1x128xf32>
    %18 = arith.addf %15, %17 : vector<1x128xf32>
    %19 = vector.broadcast %6 : f32 to vector<1x128xf32>
    %20 = arith.addf %18, %19 : vector<1x128xf32>
    %cst = arith.constant 0.000000e+00 : f32
    %21 = vector.broadcast %cst : f32 to vector<1x128xf32>
    %22 = arith.cmpf ogt, %20, %21 : vector<1x128xf32>
    %cst_4 = arith.constant 0.00999999977 : f32
    %23 = vector.broadcast %cst_4 : f32 to vector<1x128xf32>
    %24 = arith.mulf %23, %20 : vector<1x128xf32>
    %25 = arith.select %22, %20, %24 : vector<1x128xi1>, vector<1x128xf32>
    %26 = vector.broadcast %4 : f32 to vector<1x128xf32>
    %27 = arith.mulf %26, %0 : vector<1x128xf32>
    %28 = vector.broadcast %5 : f32 to vector<1x128xf32>
    %29 = arith.mulf %28, %1 : vector<1x128xf32>
    %30 = arith.addf %27, %29 : vector<1x128xf32>
    %31 = vector.broadcast %7 : f32 to vector<1x128xf32>
    %32 = arith.addf %30, %31 : vector<1x128xf32>
    %cst_5 = arith.constant 0.000000e+00 : f32
    %33 = vector.broadcast %cst_5 : f32 to vector<1x128xf32>
    %34 = arith.cmpf ogt, %32, %33 : vector<1x128xf32>
    %cst_6 = arith.constant 0.00999999977 : f32
    %35 = vector.broadcast %cst_6 : f32 to vector<1x128xf32>
    %36 = arith.mulf %35, %32 : vector<1x128xf32>
    %37 = arith.select %34, %32, %36 : vector<1x128xi1>, vector<1x128xf32>
    %38 = vector.broadcast %8 : f32 to vector<1x128xf32>
    %39 = arith.mulf %38, %25 : vector<1x128xf32>
    %40 = vector.broadcast %9 : f32 to vector<1x128xf32>
    %41 = arith.mulf %40, %37 : vector<1x128xf32>
    %42 = arith.addf %39, %41 : vector<1x128xf32>
    %43 = vector.broadcast %12 : f32 to vector<1x128xf32>
    %44 = arith.addf %42, %43 : vector<1x128xf32>
    %cst_7 = arith.constant 0.000000e+00 : f32
    %45 = vector.broadcast %cst_7 : f32 to vector<1x128xf32>
    %46 = arith.cmpf ogt, %44, %45 : vector<1x128xf32>
    %cst_8 = arith.constant 0.00999999977 : f32
    %47 = vector.broadcast %cst_8 : f32 to vector<1x128xf32>
    %48 = arith.mulf %47, %44 : vector<1x128xf32>
    %49 = arith.select %46, %44, %48 : vector<1x128xi1>, vector<1x128xf32>
    %50 = vector.broadcast %10 : f32 to vector<1x128xf32>
    %51 = arith.mulf %50, %25 : vector<1x128xf32>
    %52 = vector.broadcast %11 : f32 to vector<1x128xf32>
    %53 = arith.mulf %52, %37 : vector<1x128xf32>
    %54 = arith.addf %51, %53 : vector<1x128xf32>
    %55 = vector.broadcast %13 : f32 to vector<1x128xf32>
    %56 = arith.addf %54, %55 : vector<1x128xf32>
    %cst_9 = arith.constant 0.000000e+00 : f32
    %57 = vector.broadcast %cst_9 : f32 to vector<1x128xf32>
    %58 = arith.cmpf ogt, %56, %57 : vector<1x128xf32>
    %cst_10 = arith.constant 0.00999999977 : f32
    %59 = vector.broadcast %cst_10 : f32 to vector<1x128xf32>
    %60 = arith.mulf %59, %56 : vector<1x128xf32>
    %61 = arith.select %58, %56, %60 : vector<1x128xi1>, vector<1x128xf32>
    %62 = tpu.concatenate %49, %61 in 0 : vector<1x128xf32>, vector<1x128xf32> -> vector<2x128xf32>
    %c0_11 = arith.constant 0 : index
    %c0_12 = arith.constant 0 : index
    %63 = vector.load %arg3[%c0_11, %c0_12] : memref<2x128xf32, #tpu.memory_space<vmem>>, vector<2x128xf32>
    tpu.vector_store %arg3[%c0_11, %c0_12], %62 {strides = array<i32>} : memref<2x128xf32, #tpu.memory_space<vmem>>, vector<2x128xf32>,
    return
  }
  func.func @transform_0(%arg0: i32, %arg1: memref<12xf32, #tpu.memory_space<smem>>) -> (i32, i32) {
    %c0_i32 = arith.constant 0 : i32
    %c0_i32_0 = arith.constant 0 : i32
    return %c0_i32, %arg0 : i32, i32
  }
  func.func @transform_1(%arg0: i32, %arg1: memref<12xf32, #tpu.memory_space<smem>>) -> (i32, i32) {
    %c0_i32 = arith.constant 0 : i32
    %c0_i32_0 = arith.constant 0 : i32
    return %c0_i32, %arg0 : i32, i32
  }
}

</mosaic_0001>

<bundles_post_ra>
// kernel: discrimator_forward.1
= control target key start
LH: loop header
LB: loop body
LE: loop exit
PB: predicated region body
PF: predicated region fallthrough
CT: control target
= control target key end

     0   :  { %s133_s0 = inlined_call_operand.vmem [shape: f32[12], index: 0, kind: input, shape index: {}]   ;;  %s134_s1 = inlined_call_operand.vmem [shape: f32[2,128], index: 1, kind: input, shape index: {}]   ;;  %s135_s2 = inlined_call_operand.vmem [shape: f32[2,128], index: 2, kind: output, shape index: {}]  }
   0x1   :  { %s7_s11 = sshll.u32 %s133_s0, 4  ;;  %s8_s11 = int_to_ptr.vmem [resolvable:$true] %s7_s11 }
   0x2   :  { %s91_s12 = scalar_lea.vmem %s8_s11, 16  ;;  %p96_p1 = scmp.lt.s32.totalorder %s8_s11, %s8_s11 }
   0x3   :  { %p92_p0 = scmp.ne.s32.totalorder %s8_s11, %s91_s12  ;;  %p97_p2 = scmp.lt.s32.totalorder %s91_s12, %s91_s12 }
   0x5   :  { %p98_p3 = por %p97_p2, %p96_p1 }
   0x7   :  { %p99_p4 = pnand %p98_p3, %p92_p0 }
   0x9   :  { %102 = shalt.err (!%p99_p4)  }
   0xa   :  { %s105_s13 = smov [#allocation3]  }
   0xb   :  { %10 = dma.vmem_to_smem %s8_s11, 16, %s105_s13, [#allocation2] }
   0xc   :  { %103 = dma.done.wait [#allocation2], 16 }
   0xd   :  { %104 = vsyncadd [#allocation2], 4294967280 }
   0xe   :  { %12 = sfence }
   0xf   :  { %s17_s14 = sld [smem:[#allocation3]]  ;;  %s79_s15 = sld [smem:[#allocation3 + $0x1]]  ;;  %v15_v0 = vld [vmem:[%s134_s1] sm:$0x1]  ;;  %v16_v1 = vld [vmem:[%s134_s1 + $0x1] sm:$0x1] }
  0x10   :  { %s80_s16 = sld [smem:[#allocation3 + $0x2]]  ;;  %s81_s17 = sld [smem:[#allocation3 + $0x3]]  ;;  %vm72_vm4 = vcmask 1040384  }
  0x11   :  { %s82_s18 = sld [smem:[#allocation3 + $0x4]]  ;;  %s83_s19 = sld [smem:[#allocation3 + $0x5]] }
  0x12   :  { %s84_s23 = sld [smem:[#allocation3 + $0x6]]  ;;  %s86_s24 = sld [smem:[#allocation3 + $0x8]] }
  0x13   :  { %s85_s25 = sld [smem:[#allocation3 + $0x7]]  ;;  %s87_s26 = sld [smem:[#allocation3 + $0x9]] }
  0x14   :  { %s88_s27 = sld [smem:[#allocation3 + $0xa]]  ;;  %s89_s28 = sld [smem:[#allocation3 + $0xb]] }
  0x15   :  { %v29_v2 = vstv %s17_s14  ;;  %v31_v4 = vstv %s79_s15 }
  0x16   :  { %v30_v3 = vmul.f32 %v29_v2, %v15_v0  ;;  %v39_v5 = vstv %s80_s16  ;;  %v32_v6 = vmul.f32 %v31_v4, %v16_v1  ;;  %v41_v8 = vstv %s81_s17 }
  0x17   :  { %v40_v7 = vmul.f32 %v39_v5, %v15_v0  ;;  %v34_v9 = vstv %s82_s18  ;;  %v42_v10 = vmul.f32 %v41_v8, %v16_v1  ;;  %v44_v12 = vstv %s83_s19 }
  0x18   :  { %v33_v11 = vadd.f32 %v32_v6, %v30_v3  ;;  %v49_v17 = vstv %s84_s23  ;;  %v59_v18 = vstv %s86_s24 }
  0x19   :  { %v43_v13 = vadd.f32 %v42_v10, %v40_v7  ;;  %v51_v20 = vstv %s85_s25  ;;  %v61_v21 = vstv %s87_s26 }
  0x1a   :  { %v35_v14 = vadd.f32 %v34_v9, %v33_v11  ;;  %v54_v28 = vstv %s88_s27  ;;  %v64_v29 = vstv %s89_s28 }
  0x1b   :  { %v45_v15 = vadd.f32 %v44_v12, %v43_v13 }
  0x1c   :  { %vm36_vm0 = vcmp.gt.f32.partialorder %v35_v14, 0.0  ;;  %v37_v16 = vmul.f32 0.01, %v35_v14 }
  0x1d   :  { %vm46_vm1 = vcmp.gt.f32.partialorder %v45_v15, 0.0  ;;  %v47_v19 = vmul.f32 0.01, %v45_v15 }
  0x1e   :  { %v38_v22 = vsel %vm36_vm0, %v35_v14, %v37_v16 }
  0x1f   :  { %v48_v23 = vsel %vm46_vm1, %v45_v15, %v47_v19  ;;  %v50_v24 = vmul.f32 %v49_v17, %v38_v22  ;;  %v60_v25 = vmul.f32 %v59_v18, %v38_v22 }
  0x20   :  { %v52_v26 = vmul.f32 %v51_v20, %v48_v23  ;;  %v62_v27 = vmul.f32 %v61_v21, %v48_v23 }
  0x22   :  { %v53_v30 = vadd.f32 %v52_v26, %v50_v24  ;;  %v63_v31 = vadd.f32 %v62_v27, %v60_v25 }
  0x24   :  { %v55_v32 = vadd.f32 %v54_v28, %v53_v30  ;;  %v65_v33 = vadd.f32 %v64_v29, %v63_v31 }
  0x26   :  { %vm56_vm2 = vcmp.gt.f32.partialorder %v55_v32, 0.0  ;;  %v57_v34 = vmul.f32 0.01, %v55_v32  ;;  %vm66_vm3 = vcmp.gt.f32.partialorder %v65_v33, 0.0  ;;  %v67_v35 = vmul.f32 0.01, %v65_v33 }
  0x28   :  { %v58_v36 = vsel %vm56_vm2, %v55_v32, %v57_v34  ;;  %v68_v37 = vsel %vm66_vm3, %v65_v33, %v67_v35 }
  0x29   :  { %v70_v38 = vrot.slane %v68_v37, 7 }
  0x2b   :  { %v73_v39 = vsel %vm72_vm4, %v58_v36, %v70_v38 }
  0x2c   :  { %74 = vst [vmem:[%s135_s2] sm:$0x3] %v73_v39 }

</bundles_post_ra>
